<compile_context>
chip_gen: v7x
topology: tpu7x:2x2x1
jax: 0.10.0
libtpu: 0.0.40
codegen_flags: <defaults>
</compile_context>

<pallas_src>
import jax
import jax.numpy as jnp
from jax.experimental import pallas as pl
from jax.experimental.pallas import tpu as pltpu


def _round_up(x, m):
    return ((x + m - 1) // m) * m


def mlp_kernel(x_ref, w1_ref, b1_ref, w2_ref, b2_ref, o_ref):
    # hidden = relu(x @ W1 + b1)  — bf16 MXU operands, f32 accumulation.
    x = x_ref[...].astype(jnp.bfloat16)          # cast in-kernel (free on VPU)
    h = jnp.dot(x, w1_ref[...], preferred_element_type=jnp.float32)
    h = jnp.maximum(h + b1_ref[...], 0.0)
    # predict = hidden @ W2 + b2
    y = jnp.dot(h.astype(jnp.bfloat16), w2_ref[...],
                preferred_element_type=jnp.float32)
    o_ref[...] = y + b2_ref[...]
    # TODO(synk): the PyTorch forward's print() calls and x.register_hook(...)
    # (a backward-pass gradient hook) are host-side / autograd side effects
    # with no Pallas forward-kernel equivalent.


def prepare_params(w1, b1, w2, b2):
    """One-time parameter prep: bf16 cast + lane-dense (128-mult) hidden dim."""
    n_features, n_hidden = w1.shape
    n_output = w2.shape[1]
    h_pad = _round_up(n_hidden, 128)
    # TODO(synk): for realistic (large) n_hidden on v6e/v7x, pad/chunk the
    # hidden dim in 256-wide tiles and stream W1/W2 instead of keeping both
    # fully resident.
    w1p = jnp.pad(w1.astype(jnp.bfloat16), ((0, 0), (0, h_pad - n_hidden)))
    w2p = jnp.pad(w2.astype(jnp.bfloat16), ((0, h_pad - n_hidden), (0, 0)))
    b1p = jnp.pad(b1.reshape(1, n_hidden).astype(jnp.float32),
                  ((0, 0), (0, h_pad - n_hidden)))
    b2p = b2.reshape(1, n_output).astype(jnp.float32)
    return w1p, b1p, w2p, b2p


def _choose_tm(batch, tm_max):
    """Multiple of 16; >=2 grid steps for large batches; small tail padding."""
    if batch <= 16:
        return _round_up(batch, 8)
    return min(tm_max, _round_up(pl.cdiv(batch, 2), 16))


def net_forward(x, w1p, b1p, w2p, b2p, *, tm_max=1024):
    """relu(x @ W1 + b1) @ W2 + b2 with a batch grid and resident weights."""
    batch, n_features = x.shape
    h_pad = w1p.shape[1]
    n_output = w2p.shape[1]

    tm = _choose_tm(batch, tm_max)
    b_pad = _round_up(batch, tm)
    x_in = x if b_pad == batch else jnp.pad(x, ((0, b_pad - batch), (0, 0)))
    grid = (b_pad // tm,)

    # Advisory cost estimate from the REAL (unpadded) dims.
    n_hidden_real = h_pad  # upper bound; harmless for an advisory hint
    flops = 2 * batch * n_features * n_hidden_real + 2 * batch * n_hidden_real * n_output
    bytes_accessed = (batch * n_features * 4        # x read (f32)
                      + w1p.size * 2 + w2p.size * 2
                      + b1p.size * 4 + b2p.size * 4
                      + batch * n_output * 4)       # out write (f32)
    cost = pl.CostEstimate(flops=flops, transcendentals=0,
                           bytes_accessed=bytes_accessed)

    # VMEM budget: every input/output is double-buffered by default
    # (including the constant-index "resident" weights), plus in-kernel temps.
    vmem_needed = (
        2 * tm * n_features * 4            # x tiles (2 bufs, f32)
        + 2 * tm * n_output * 4            # out tiles (2 bufs, f32)
        + 2 * n_features * h_pad * 2       # W1 (2 bufs, bf16)
        + 2 * h_pad * n_output * 2         # W2 (2 bufs, bf16)
        + 2 * h_pad * 4 + 2 * n_output * 4  # b1 / b2 (2 bufs, f32)
        + tm * h_pad * (4 + 2)             # hidden temp f32 + bf16 copy
        + tm * n_output * 4                # y temp
    )
    # Per-generation cap with ~25% headroom for Mosaic internal scratch
    # (~48 MiB on v7x, ~96 MiB on v5e/v6e).
    try:
        cap = int(getattr(pltpu.get_tpu_info(), "vmem_capacity_bytes", 64 << 20))
    except Exception:
        cap = 64 << 20
    vmem_limit = int(min(max(2 * vmem_needed, 16 << 20), cap * 3 // 4))

    out_padded = pl.pallas_call(
        mlp_kernel,
        out_shape=jax.ShapeDtypeStruct((b_pad, n_output), jnp.float32),
        grid_spec=pltpu.PrefetchScalarGridSpec(
            num_scalar_prefetch=0,
            grid=grid,
            in_specs=[
                pl.BlockSpec((tm, n_features), lambda i: (i, 0)),   # x tile (pipelined)
                pl.BlockSpec((n_features, h_pad), lambda i: (0, 0)),  # W1 resident
                pl.BlockSpec((1, h_pad), lambda i: (0, 0)),           # b1 resident
                pl.BlockSpec((h_pad, n_output), lambda i: (0, 0)),    # W2 resident
                pl.BlockSpec((1, n_output), lambda i: (0, 0)),        # b2 resident
            ],
            out_specs=pl.BlockSpec((tm, n_output), lambda i: (i, 0)),
        ),
        compiler_params=pltpu.CompilerParams(
            dimension_semantics=("parallel",),   # batch axis -> both TCs on v7x
            vmem_limit_bytes=vmem_limit,
        ),
        cost_estimate=cost,
    )(x_in, w1p, b1p, w2p, b2p)

    return out_padded if b_pad == batch else out_padded[:batch]


if __name__ == "__main__":
    # Small shapes consistent with Net(n_features, n_hidden, n_output).
    batch, n_features, n_hidden, n_output = 8, 4, 32, 4

    key = jax.random.PRNGKey(0)
    kx, k1, kb1, k2, kb2 = jax.random.split(key, 5)

    x = jax.random.normal(kx, (batch, n_features), dtype=jnp.float32)
    # Deterministic parameter init (uniform, roughly matching nn.Linear scale).
    bound1 = 1.0 / (n_features ** 0.5)
    w1 = jax.random.uniform(k1, (n_features, n_hidden), jnp.float32, -bound1, bound1)
    b1 = jax.random.uniform(kb1, (1, n_hidden), jnp.float32, -bound1, bound1)
    bound2 = 1.0 / (n_hidden ** 0.5)
    w2 = jax.random.uniform(k2, (n_hidden, n_output), jnp.float32, -bound2, bound2)
    b2 = jax.random.uniform(kb2, (1, n_output), jnp.float32, -bound2, bound2)

    # One-time parameter prep (hoisted out of the forward pass).
    w1p, b1p, w2p, b2p = prepare_params(w1, b1, w2, b2)
    w1p, b1p, w2p, b2p = jax.block_until_ready((w1p, b1p, w2p, b2p))

    fwd = jax.jit(net_forward)
    out = fwd(x, w1p, b1p, w2p, b2p)
    jax.block_until_ready(out)
    assert out.shape == (batch, n_output)

    # Reference 1: plain f32 math (original PyTorch semantics) — loose tolerance
    # because the kernel feeds bf16 operands to the MXU (f32 accumulation).
    ref_f32 = jnp.maximum(x @ w1 + b1, 0.0) @ w2 + b2
    assert jnp.allclose(out, ref_f32, atol=3e-2, rtol=3e-2)

    # Reference 2: bf16-operand-aware reference — tight tolerance.
    xb = x.astype(jnp.bfloat16).astype(jnp.float32)
    w1b = w1.astype(jnp.bfloat16).astype(jnp.float32)
    w2b = w2.astype(jnp.bfloat16).astype(jnp.float32)
    hb = jnp.maximum(xb @ w1b + b1, 0.0).astype(jnp.bfloat16).astype(jnp.float32)
    ref_bf16 = hb @ w2b + b2
    assert jnp.allclose(out, ref_bf16, atol=1e-4, rtol=1e-4)

    print("KERNEL_OK")
</pallas_src>

<mosaic_0001>
module attributes {stable_mosaic.version = 11 : i64} {
  func.func @mlp_kernel(%arg0: i32, %arg1: memref<8x4xf32, #tpu.memory_space<vmem>>, %arg2: memref<4x128xbf16, #tpu.memory_space<vmem>>, %arg3: memref<1x128xf32, #tpu.memory_space<vmem>>, %arg4: memref<128x4xbf16, #tpu.memory_space<vmem>>, %arg5: memref<1x4xf32, #tpu.memory_space<vmem>>, %arg6: memref<8x4xf32, #tpu.memory_space<vmem>>) attributes {dimension_semantics = [#tpu.dimension_semantics<parallel>], iteration_bounds = array<i64: 1>, scalar_prefetch = 0 : i64, scratch_operands = 0 : i64, tpu.core_type = #tpu.core_type<tc>, window_params = [{transform_indices = @transform_0, window_bounds = array<i64: 8, 4>}, {pipeline_mode = #tpu.pipeline_mode<synchronous>, transform_indices = @transform_1, window_bounds = array<i64: 4, 128>}, {pipeline_mode = #tpu.pipeline_mode<synchronous>, transform_indices = @transform_2, window_bounds = array<i64: 1, 128>}, {pipeline_mode = #tpu.pipeline_mode<synchronous>, transform_indices = @transform_3, window_bounds = array<i64: 128, 4>}, {pipeline_mode = #tpu.pipeline_mode<synchronous>, transform_indices = @transform_4, window_bounds = array<i64: 1, 4>}, {transform_indices = @transform_5, window_bounds = array<i64: 8, 4>}]} {
    %c0 = arith.constant 0 : index
    %c0_0 = arith.constant 0 : index
    %0 = vector.load %arg1[%c0, %c0_0] : memref<8x4xf32, #tpu.memory_space<vmem>>, vector<8x4xf32>
    %1 = arith.truncf %0 : vector<8x4xf32> to vector<8x4xbf16>
    %c0_1 = arith.constant 0 : index
    %c0_2 = arith.constant 0 : index
    %2 = vector.load %arg2[%c0_1, %c0_2] : memref<4x128xbf16, #tpu.memory_space<vmem>>, vector<4x128xbf16>
    %cst = arith.constant dense<0.000000e+00> : vector<8x128xf32>
    %3 = tpu.matmul %1, %2, %cst {dimension_numbers = #tpu.dot_dimension_numbers<[1], [0], [0], [1], [0, 0, 1, 1], [], []>} : vector<8x4xbf16>, vector<4x128xbf16>, vector<8x128xf32> -> vector<8x128xf32>
    %c0_3 = arith.constant 0 : index
    %c0_4 = arith.constant 0 : index
    %4 = vector.load %arg3[%c0_3, %c0_4] : memref<1x128xf32, #tpu.memory_space<vmem>>, vector<1x128xf32>
    %5 = vector.broadcast %4 : vector<1x128xf32> to vector<8x128xf32>
    %6 = arith.addf %3, %5 : vector<8x128xf32>
    %cst_5 = arith.constant 0.000000e+00 : f32
    %7 = vector.broadcast %cst_5 : f32 to vector<8x128xf32>
    %8 = arith.maximumf %6, %7 : vector<8x128xf32>
    %9 = arith.truncf %8 : vector<8x128xf32> to vector<8x128xbf16>
    %c0_6 = arith.constant 0 : index
    %c0_7 = arith.constant 0 : index
    %10 = vector.load %arg4[%c0_6, %c0_7] : memref<128x4xbf16, #tpu.memory_space<vmem>>, vector<128x4xbf16>
    %cst_8 = arith.constant dense<0.000000e+00> : vector<8x4xf32>
    %11 = tpu.matmul %9, %10, %cst_8 {dimension_numbers = #tpu.dot_dimension_numbers<[1], [0], [0], [1], [0, 0, 1, 1], [], []>} : vector<8x128xbf16>, vector<128x4xbf16>, vector<8x4xf32> -> vector<8x4xf32>
    %c0_9 = arith.constant 0 : index
    %c0_10 = arith.constant 0 : index
    %12 = vector.load %arg5[%c0_9, %c0_10] : memref<1x4xf32, #tpu.memory_space<vmem>>, vector<1x4xf32>
    %13 = vector.broadcast %12 : vector<1x4xf32> to vector<8x4xf32>
    %14 = arith.addf %11, %13 : vector<8x4xf32>
    %c0_11 = arith.constant 0 : index
    %c0_12 = arith.constant 0 : index
    %15 = vector.load %arg6[%c0_11, %c0_12] : memref<8x4xf32, #tpu.memory_space<vmem>>, vector<8x4xf32>
    tpu.vector_store %arg6[%c0_11, %c0_12], %14 {strides = array<i32>} : memref<8x4xf32, #tpu.memory_space<vmem>>, vector<8x4xf32>,
    return
  }
  func.func @transform_0(%arg0: i32) -> (i32, i32) {
    %c0_i32 = arith.constant 0 : i32
    %c0_i32_0 = arith.constant 0 : i32
    return %arg0, %c0_i32 : i32, i32
  }
  func.func @transform_1(%arg0: i32) -> (i32, i32) {
    %c0_i32 = arith.constant 0 : i32
    %c0_i32_0 = arith.constant 0 : i32
    %c0_i32_1 = arith.constant 0 : i32
    return %c0_i32, %c0_i32_0 : i32, i32
  }
  func.func @transform_2(%arg0: i32) -> (i32, i32) {
    %c0_i32 = arith.constant 0 : i32
    %c0_i32_0 = arith.constant 0 : i32
    %c0_i32_1 = arith.constant 0 : i32
    return %c0_i32, %c0_i32_0 : i32, i32
  }
  func.func @transform_3(%arg0: i32) -> (i32, i32) {
    %c0_i32 = arith.constant 0 : i32
    %c0_i32_0 = arith.constant 0 : i32
    %c0_i32_1 = arith.constant 0 : i32
    return %c0_i32, %c0_i32_0 : i32, i32
  }
  func.func @transform_4(%arg0: i32) -> (i32, i32) {
    %c0_i32 = arith.constant 0 : i32
    %c0_i32_0 = arith.constant 0 : i32
    %c0_i32_1 = arith.constant 0 : i32
    return %c0_i32, %c0_i32_0 : i32, i32
  }
  func.func @transform_5(%arg0: i32) -> (i32, i32) {
    %c0_i32 = arith.constant 0 : i32
    %c0_i32_0 = arith.constant 0 : i32
    return %arg0, %c0_i32 : i32, i32
  }
}

</mosaic_0001>

<bundles_post_ra>
// kernel: net_forward.1
= control target key start
LH: loop header
LB: loop body
LE: loop exit
PB: predicated region body
PF: predicated region fallthrough
CT: control target
= control target key end

     0   :  { %vm35_vm0 = vcmask 1041408   ;;  %v255_v0 = vmov 0.0   ;;  %vm256_vm1 = vmmov 0   ;;  %vm31_vm2 = vcmask 31744   ;;  %s328_s1 = inlined_call_operand.vmem [shape: bf16[4,128], index: 1, kind: input, shape index: {}]   ;;  %s329_s0 = inlined_call_operand.vmem [shape: f32[8,4], index: 0, kind: input, shape index: {}]   ;;  %s330_s3 = inlined_call_operand.vmem [shape: bf16[128,4], index: 3, kind: input, shape index: {}]   ;;  %s331_s2 = inlined_call_operand.vmem [shape: f32[1,128], index: 2, kind: input, shape index: {}]   ;;  %s332_s4 = inlined_call_operand.vmem [shape: f32[1,4], index: 4, kind: input, shape index: {}]   ;;  %s333_s5 = inlined_call_operand.vmem [shape: f32[8,4], index: 5, kind: output, shape index: {}]  }
   0x1   :  { %219 = vmatprep.subr.bf16.mxu0 %v255_v0  ;;  %v23_v1 = vld [vmem:[%s328_s1] sm:$0x3]  ;;  %221 = vmatprep.mubr.msk.bf16.mxu0 %vm256_vm1, %v255_v0  ;;  %v248_v6 = vld [vmem:[%s330_s3 + $0x8] sm:$0xff]   ;;  %v249_v7 = vld [vmem:[%s330_s3 + $0x10] sm:$0xff]  }
   0x2   :  { %v21_v2 = vld [vmem:[%s329_s0] sm:$0xff]  ;;  %v37_v3 = vsel %vm35_vm0, %v23_v1, 0  ;;  %225 = vmatprep.subr.bf16.mxu1 %v255_v0  ;;  %241 = vmatprep.mubr.msk.bf16.mxu1 %vm256_vm1, %v255_v0  ;;  %v250_v8 = vld [vmem:[%s330_s3 + $0x18] sm:$0xff]   ;;  %v252_v10 = vld [vmem:[%s330_s3 + $0x28] sm:$0xff]  }
   0x3   :  { %v22_v4 = vpack.c.bf16 %v21_v2, %v21_v2  ;;  %v247_v5 = vld [vmem:[%s330_s3] sm:$0xff]   ;;  %220 = vmatpush3.bf16.msra.mxu0 %v37_v3  ;;  %v253_v11 = vld [vmem:[%s330_s3 + $0x30] sm:$0xff]   ;;  %v254_v12 = vld [vmem:[%s330_s3 + $0x38] sm:$0xff]  }
   0x4   :  { %226 = vmatpush3.bf16.msra.mxu1 %v247_v5  ;;  %v251_v9 = vld [vmem:[%s330_s3 + $0x20] sm:$0xff]  }
   0x5   :  { %227 = vmatprep.subr.bf16.mxu1 %v255_v0  ;;  %v197_v13 = vld [vmem:[%s331_s2] ss:$0 sm:$0xff] }
   0x6   :  { %222 = vmatmul.mubr.msk.bf16.vlgmr.msra.gmra.mrb[0].mxu0 %vm31_vm2, %v22_v4  ;;  %v199_v21 = vld [vmem:[%s332_s4] ss:$0 sm:$0xff] }
   0x8   :  { %228 = vmatpush3.bf16.msra.mxu1 %v248_v6 }
   0x9   :  { %229 = vmatprep.subr.bf16.mxu1 %v255_v0 }
   0xc   :  { %230 = vmatpush3.bf16.msra.mxu1 %v249_v7 }
   0xd   :  { %231 = vmatprep.subr.bf16.mxu1 %v255_v0 }
  0x10   :  { %232 = vmatpush3.bf16.msra.mxu1 %v250_v8 }
  0x11   :  { %233 = vmatprep.subr.bf16.mxu1 %v255_v0 }
  0x14   :  { %234 = vmatpush3.bf16.msra.mxu1 %v251_v9 }
  0x15   :  { %235 = vmatprep.subr.bf16.mxu1 %v255_v0 }
  0x18   :  { %236 = vmatpush3.bf16.msra.mxu1 %v252_v10 }
  0x19   :  { %237 = vmatprep.subr.bf16.mxu1 %v255_v0 }
  0x1c   :  { %238 = vmatpush3.bf16.msra.mxu1 %v253_v11 }
  0x1d   :  { %239 = vmatprep.subr.bf16.mxu1 %v255_v0 }
  0x20   :  { %240 = vmatpush3.bf16.msra.mxu1 %v254_v12 }
  0xd9   :  { %v73_v14 = vpop.f32.mrb[0].mxu0 }
  0xda   :  { %v74_v15 = vadd.f32 %v197_v13, %v73_v14  ;;  %v223_v16 = vpop.f32.mrb[1].mxu0 }
  0xdb   :  { %v76_v17 = vpop.f32.mrb[2].mxu0 }
  0xdc   :  { %v79_v18 = vmax.f32 %v74_v15, 0.0  ;;  %v224_v19 = vpop.f32.mrb[3].mxu0 }
  0xde   :  { %v80_v20 = vpack.c.bf16 %v79_v18, %v79_v18 }
  0xe0   :  { %242 = vmatmul.mubr.bf16.vlgmr.msra.gmra.mrb[0].mxu1 %v80_v20 }
 0x1b3   :  { %v186_v22 = vpop.f32.mrb[0].mxu1 }
 0x1b4   :  { %v187_v23 = vadd.f32 %v199_v21, %v186_v22  ;;  %v243_v24 = vpop.f32.mrb[1].mxu1 }
 0x1b5   :  { %v189_v25 = vpop.f32.mrb[2].mxu1 }
 0x1b6   :  { %192 = vst.msk [vmem:[%s333_s5] sm:$0xff] %vm31_vm2, %v187_v23  ;;  %v244_v26 = vpop.f32.mrb[3].mxu1 }

</bundles_post_ra>
